<compile_context>
chip_gen: v5e
topology: v5e:2x2
jax: 0.10.0
libtpu: 0.0.40
codegen_flags: <defaults>
</compile_context>

<pallas_src>
import numpy as np
import jax
import jax.numpy as jnp
from jax.experimental import pallas as pl
from jax.experimental.pallas import tpu as pltpu


def _round_up(x, m):
    return ((x + m - 1) // m) * m


# ----------------------------------------------------------------------------
# Parameter init (matches nn.init.kaiming_normal_(mode='fan_out', relu) for a
# Conv1d weight of shape (out_ch, in_ch, 1): std = sqrt(2 / out_ch)).
# ----------------------------------------------------------------------------
def _kaiming_normal_fan_out(key, out_ch, in_ch):
    std = np.sqrt(2.0 / out_ch).astype(np.float32)
    return std * jax.random.normal(key, (out_ch, in_ch), dtype=jnp.float32)


def init_densenet_params(key, num_layers, num_input_features, bn_size, growth_rate):
    params = []
    for i in range(num_layers):
        c_in = num_input_features + i * growth_rate
        key, k1, k2 = jax.random.split(key, 3)
        w1 = _kaiming_normal_fan_out(k1, bn_size * growth_rate, c_in)
        w2 = _kaiming_normal_fan_out(k2, growth_rate, bn_size * growth_rate)
        params.append((w1, w2))
    return params


# ----------------------------------------------------------------------------
# Weight packing: one contiguous, 8-sublane / 128-lane aligned slab holding
# every layer's (w1, w2).  Loaded once, VMEM-resident for the whole kernel.
# ----------------------------------------------------------------------------
def _pack_weights(params):
    k_max = max(max(w1.shape[1], w2.shape[1]) for w1, w2 in params)
    k_pad = _round_up(k_max, 128)
    meta = []
    r = 0
    for w1, w2 in params:
        o1, c_in = w1.shape
        g = w2.shape[0]
        r1 = r
        r += _round_up(o1, 8)
        r2 = r
        r += _round_up(g, 8)
        meta.append((r1, o1, c_in, r2, g))
    r_total = _round_up(r, 8)
    slab = np.zeros((r_total, k_pad), dtype=np.float32)
    for (r1, o1, c_in, r2, g), (w1, w2) in zip(meta, params):
        slab[r1:r1 + o1, :c_in] = np.asarray(w1)
        slab[r2:r2 + g, :w2.shape[1]] = np.asarray(w2)
    return jnp.asarray(slab), tuple(meta)


# ----------------------------------------------------------------------------
# Fused kernel: one (batch, lane-tile) block of the full dense stack.
#   x_ref : (C0, Nt)        input channels for this tile (batch dim squeezed)
#   w_ref : (R_total, Kpad) packed weights (resident across grid steps)
#   o_ref : (C_total, Nt)   full concatenated output tile (written in place)
#   h_ref : (C_total, Nt)   VMEM scratch holding ReLU'd features so far
# ----------------------------------------------------------------------------
def _make_fused_kernel(c0, meta):
    n_layers = len(meta)

    def kernel(x_ref, w_ref, o_ref, h_ref):
        x = x_ref[...]
        o_ref[0:c0, :] = x
        # Layer-0 micro-opt: ReLU the loaded x directly (no o_ref read-back).
        h_ref[0:c0, :] = jnp.maximum(x, 0.0)
        c = c0
        for li, (r1, o1, c_in, r2, g) in enumerate(meta):   # unrolled at trace
            # relu1 -> conv1(1x1) -> relu2 -> conv2(1x1) on this tile.
            w1 = w_ref[r1:r1 + o1, 0:c_in]                           # (O1, c)
            y1 = jnp.dot(w1, h_ref[0:c, :],
                         preferred_element_type=jnp.float32)         # (O1, Nt)
            h2 = jnp.maximum(y1, 0.0)
            w2 = w_ref[r2:r2 + g, 0:o1]                              # (G, O1)
            y2 = jnp.dot(w2, h2, preferred_element_type=jnp.float32)  # (G, Nt)
            # Dense connection: new features go into the next channel slice.
            o_ref[c:c + g, :] = y2.astype(o_ref.dtype)
            if li + 1 < n_layers:   # last layer's relu slab is never read
                h_ref[c:c + g, :] = jnp.maximum(y2, 0.0)
            c += g

    return kernel


# ----------------------------------------------------------------------------
# Wrapper: tile (batch, lane) in the native (B, C, L) layout, fused kernel.
# ----------------------------------------------------------------------------
def densenet_forward(x, params, *, target_tile_bytes=12 << 20):
    B, C0, L = x.shape
    G = params[0][1].shape[0]
    C_total = C0 + len(params) * G

    w_slab, meta = _pack_weights(params)
    w_bytes = int(w_slab.size) * 4

    # Footprint-driven lane-tile choice: widest 128-aligned tile whose
    # double-buffered in/out tiles + relu scratch land near target_tile_bytes,
    # capped so the whole working set stays well inside v7x's 64 MiB/TC VMEM.
    per_col = 4 * (2 * C0 + 3 * C_total)      # 2x in + 2x out + 1x relu scratch
    nt = (target_tile_bytes // per_col) // 128 * 128
    nt = int(max(128, min(nt, _round_up(L, 128), 16384)))
    cap_bytes = 40 << 20                       # conservative across generations
    while nt > 128 and per_col * nt + 2 * w_bytes > cap_bytes:
        nt -= 128

    l_pad = _round_up(L, nt)
    xp = x if l_pad == L else jnp.pad(x, ((0, 0), (0, 0), (0, l_pad - L)))
    grid = (B, l_pad // nt)

    # Exact VMEM footprint + margin (works on v5e 16 MiB scoped default too).
    footprint = per_col * nt + 2 * w_bytes
    vmem_limit = int(min(max(footprint + (8 << 20), 16 << 20), 56 << 20))

    out = pl.pallas_call(
        _make_fused_kernel(C0, meta),
        out_shape=jax.ShapeDtypeStruct((B, C_total, l_pad), x.dtype),
        grid=grid,
        in_specs=[
            # Squeezed batch dim: kernel sees (C0, nt) but x stays (B, C0, L).
            pl.BlockSpec((None, C0, nt), lambda b, i: (b, 0, i)),
            # Resident weight slab (constant index_map -> no per-step re-DMA).
            pl.BlockSpec(w_slab.shape, lambda b, i: (0, 0)),
        ],
        out_specs=pl.BlockSpec((None, C_total, nt), lambda b, i: (b, 0, i)),
        scratch_shapes=[pltpu.VMEM((C_total, nt), jnp.float32)],
        compiler_params=pltpu.CompilerParams(
            dimension_semantics=("parallel", "parallel"),
            vmem_limit_bytes=vmem_limit,
        ),
    )(xp, w_slab)

    return out if l_pad == L else out[:, :, :L]


# ----------------------------------------------------------------------------
# Plain-JAX reference matching the PyTorch forward semantics.
# ----------------------------------------------------------------------------
def densenet_reference(x, params):
    for w1, w2 in params:
        h = jnp.maximum(x, 0.0)
        y1 = jnp.einsum('oc,bcl->bol', w1, h)
        h2 = jnp.maximum(y1, 0.0)
        y2 = jnp.einsum('oc,bcl->bol', w2, h2)
        x = jnp.concatenate([x, y2], axis=1)
    return x


if __name__ == "__main__":
    # Small, TPU-friendly shapes: grid = (B=2, L/nt) -> 2 parallel steps.
    B = 2
    num_input_features = 8
    growth_rate = 8
    bn_size = 2
    num_layers = 3
    L = 512

    key = jax.random.PRNGKey(0)
    kx, kp = jax.random.split(key)
    x = jax.random.normal(kx, (B, num_input_features, L), dtype=jnp.float32)
    params = init_densenet_params(kp, num_layers, num_input_features,
                                  bn_size, growth_rate)

    out = densenet_forward(x, params)
    out = jax.block_until_ready(out)

    ref = densenet_reference(x, params)
    expected_channels = num_input_features + num_layers * growth_rate
    assert out.shape == (B, expected_channels, L), out.shape
    assert np.allclose(np.asarray(out), np.asarray(ref), rtol=1e-4, atol=1e-4)

    print("KERNEL_OK")
</pallas_src>

<mosaic_0001>
module attributes {stable_mosaic.version = 11 : i64} {
  func.func @kernel(%arg0: i32, %arg1: i32, %arg2: memref<1x8x512xf32, #tpu.memory_space<vmem>>, %arg3: memref<72x128xf32, #tpu.memory_space<vmem>>, %arg4: memref<1x32x512xf32, #tpu.memory_space<vmem>>, %arg5: memref<32x512xf32, #tpu.memory_space<vmem>>) attributes {dimension_semantics = [#tpu.dimension_semantics<parallel>, #tpu.dimension_semantics<parallel>], iteration_bounds = array<i64: 2, 1>, scalar_prefetch = 0 : i64, scratch_operands = 1 : i64, tpu.core_type = #tpu.core_type<tc>, window_params = [{transform_indices = @transform_0, window_bounds = array<i64: 1, 8, 512>}, {pipeline_mode = #tpu.pipeline_mode<synchronous>, transform_indices = @transform_1, window_bounds = array<i64: 72, 128>}, {transform_indices = @transform_2, window_bounds = array<i64: 1, 32, 512>}]} {
    %c0 = arith.constant 0 : index
    %c0_0 = arith.constant 0 : index
    %c0_1 = arith.constant 0 : index
    %0 = vector.load %arg2[%c0, %c0_0, %c0_1] : memref<1x8x512xf32, #tpu.memory_space<vmem>>, vector<1x8x512xf32>
    %1 = vector.shape_cast %0 : vector<1x8x512xf32> to vector<8x512xf32>
    %c0_2 = arith.constant 0 : index
    %c0_3 = arith.constant 0 : index
    %c0_4 = arith.constant 0 : index
    %2 = vector.load %arg4[%c0_2, %c0_3, %c0_4] : memref<1x32x512xf32, #tpu.memory_space<vmem>>, vector<1x8x512xf32>
    %3 = vector.shape_cast %2 : vector<1x8x512xf32> to vector<8x512xf32>
    %4 = vector.shape_cast %1 : vector<8x512xf32> to vector<1x8x512xf32>
    tpu.vector_store %arg4[%c0_2, %c0_3, %c0_4], %4 {strides = array<i32>} : memref<1x32x512xf32, #tpu.memory_space<vmem>>, vector<1x8x512xf32>,
    %cst = arith.constant 0.000000e+00 : f32
    %5 = vector.broadcast %cst : f32 to vector<8x512xf32>
    %6 = arith.maximumf %1, %5 : vector<8x512xf32>
    %c0_5 = arith.constant 0 : index
    %c0_6 = arith.constant 0 : index
    %7 = vector.load %arg5[%c0_5, %c0_6] : memref<32x512xf32, #tpu.memory_space<vmem>>, vector<8x512xf32>
    tpu.vector_store %arg5[%c0_5, %c0_6], %6 {strides = array<i32>} : memref<32x512xf32, #tpu.memory_space<vmem>>, vector<8x512xf32>,
    %c0_7 = arith.constant 0 : index
    %c0_8 = arith.constant 0 : index
    %8 = vector.load %arg3[%c0_7, %c0_8] : memref<72x128xf32, #tpu.memory_space<vmem>>, vector<16x8xf32>
    %c0_9 = arith.constant 0 : index
    %c0_10 = arith.constant 0 : index
    %9 = vector.load %arg5[%c0_9, %c0_10] : memref<32x512xf32, #tpu.memory_space<vmem>>, vector<8x512xf32>
    %cst_11 = arith.constant dense<0.000000e+00> : vector<16x512xf32>
    %10 = tpu.matmul %8, %9, %cst_11 {dimension_numbers = #tpu.dot_dimension_numbers<[1], [0], [0], [1], [0, 0, 1, 1], [], []>} : vector<16x8xf32>, vector<8x512xf32>, vector<16x512xf32> -> vector<16x512xf32>
    %cst_12 = arith.constant 0.000000e+00 : f32
    %11 = vector.broadcast %cst_12 : f32 to vector<16x512xf32>
    %12 = arith.maximumf %10, %11 : vector<16x512xf32>
    %c16 = arith.constant 16 : index
    %c0_13 = arith.constant 0 : index
    %13 = vector.load %arg3[%c16, %c0_13] : memref<72x128xf32, #tpu.memory_space<vmem>>, vector<8x16xf32>
    %cst_14 = arith.constant dense<0.000000e+00> : vector<8x512xf32>
    %14 = tpu.matmul %13, %12, %cst_14 {dimension_numbers = #tpu.dot_dimension_numbers<[1], [0], [0], [1], [0, 0, 1, 1], [], []>} : vector<8x16xf32>, vector<16x512xf32>, vector<8x512xf32> -> vector<8x512xf32>
    %c0_15 = arith.constant 0 : index
    %c8 = arith.constant 8 : index
    %c0_16 = arith.constant 0 : index
    %15 = vector.load %arg4[%c0_15, %c8, %c0_16] : memref<1x32x512xf32, #tpu.memory_space<vmem>>, vector<1x8x512xf32>
    %16 = vector.shape_cast %15 : vector<1x8x512xf32> to vector<8x512xf32>
    %17 = vector.shape_cast %14 : vector<8x512xf32> to vector<1x8x512xf32>
    tpu.vector_store %arg4[%c0_15, %c8, %c0_16], %17 {strides = array<i32>} : memref<1x32x512xf32, #tpu.memory_space<vmem>>, vector<1x8x512xf32>,
    %cst_17 = arith.constant 0.000000e+00 : f32
    %18 = vector.broadcast %cst_17 : f32 to vector<8x512xf32>
    %19 = arith.maximumf %14, %18 : vector<8x512xf32>
    %c8_18 = arith.constant 8 : index
    %c0_19 = arith.constant 0 : index
    %20 = vector.load %arg5[%c8_18, %c0_19] : memref<32x512xf32, #tpu.memory_space<vmem>>, vector<8x512xf32>
    tpu.vector_store %arg5[%c8_18, %c0_19], %19 {strides = array<i32>} : memref<32x512xf32, #tpu.memory_space<vmem>>, vector<8x512xf32>,
    %c24 = arith.constant 24 : index
    %c0_20 = arith.constant 0 : index
    %21 = vector.load %arg3[%c24, %c0_20] : memref<72x128xf32, #tpu.memory_space<vmem>>, vector<16x16xf32>
    %c0_21 = arith.constant 0 : index
    %c0_22 = arith.constant 0 : index
    %22 = vector.load %arg5[%c0_21, %c0_22] : memref<32x512xf32, #tpu.memory_space<vmem>>, vector<16x512xf32>
    %cst_23 = arith.constant dense<0.000000e+00> : vector<16x512xf32>
    %23 = tpu.matmul %21, %22, %cst_23 {dimension_numbers = #tpu.dot_dimension_numbers<[1], [0], [0], [1], [0, 0, 1, 1], [], []>} : vector<16x16xf32>, vector<16x512xf32>, vector<16x512xf32> -> vector<16x512xf32>
    %cst_24 = arith.constant 0.000000e+00 : f32
    %24 = vector.broadcast %cst_24 : f32 to vector<16x512xf32>
    %25 = arith.maximumf %23, %24 : vector<16x512xf32>
    %c40 = arith.constant 40 : index
    %c0_25 = arith.constant 0 : index
    %26 = vector.load %arg3[%c40, %c0_25] : memref<72x128xf32, #tpu.memory_space<vmem>>, vector<8x16xf32>
    %cst_26 = arith.constant dense<0.000000e+00> : vector<8x512xf32>
    %27 = tpu.matmul %26, %25, %cst_26 {dimension_numbers = #tpu.dot_dimension_numbers<[1], [0], [0], [1], [0, 0, 1, 1], [], []>} : vector<8x16xf32>, vector<16x512xf32>, vector<8x512xf32> -> vector<8x512xf32>
    %c0_27 = arith.constant 0 : index
    %c16_28 = arith.constant 16 : index
    %c0_29 = arith.constant 0 : index
    %28 = vector.load %arg4[%c0_27, %c16_28, %c0_29] : memref<1x32x512xf32, #tpu.memory_space<vmem>>, vector<1x8x512xf32>
    %29 = vector.shape_cast %28 : vector<1x8x512xf32> to vector<8x512xf32>
    %30 = vector.shape_cast %27 : vector<8x512xf32> to vector<1x8x512xf32>
    tpu.vector_store %arg4[%c0_27, %c16_28, %c0_29], %30 {strides = array<i32>} : memref<1x32x512xf32, #tpu.memory_space<vmem>>, vector<1x8x512xf32>,
    %cst_30 = arith.constant 0.000000e+00 : f32
    %31 = vector.broadcast %cst_30 : f32 to vector<8x512xf32>
    %32 = arith.maximumf %27, %31 : vector<8x512xf32>
    %c16_31 = arith.constant 16 : index
    %c0_32 = arith.constant 0 : index
    %33 = vector.load %arg5[%c16_31, %c0_32] : memref<32x512xf32, #tpu.memory_space<vmem>>, vector<8x512xf32>
    tpu.vector_store %arg5[%c16_31, %c0_32], %32 {strides = array<i32>} : memref<32x512xf32, #tpu.memory_space<vmem>>, vector<8x512xf32>,
    %c48 = arith.constant 48 : index
    %c0_33 = arith.constant 0 : index
    %34 = vector.load %arg3[%c48, %c0_33] : memref<72x128xf32, #tpu.memory_space<vmem>>, vector<16x24xf32>
    %c0_34 = arith.constant 0 : index
    %c0_35 = arith.constant 0 : index
    %35 = vector.load %arg5[%c0_34, %c0_35] : memref<32x512xf32, #tpu.memory_space<vmem>>, vector<24x512xf32>
    %cst_36 = arith.constant dense<0.000000e+00> : vector<16x512xf32>
    %36 = tpu.matmul %34, %35, %cst_36 {dimension_numbers = #tpu.dot_dimension_numbers<[1], [0], [0], [1], [0, 0, 1, 1], [], []>} : vector<16x24xf32>, vector<24x512xf32>, vector<16x512xf32> -> vector<16x512xf32>
    %cst_37 = arith.constant 0.000000e+00 : f32
    %37 = vector.broadcast %cst_37 : f32 to vector<16x512xf32>
    %38 = arith.maximumf %36, %37 : vector<16x512xf32>
    %c64 = arith.constant 64 : index
    %c0_38 = arith.constant 0 : index
    %39 = vector.load %arg3[%c64, %c0_38] : memref<72x128xf32, #tpu.memory_space<vmem>>, vector<8x16xf32>
    %cst_39 = arith.constant dense<0.000000e+00> : vector<8x512xf32>
    %40 = tpu.matmul %39, %38, %cst_39 {dimension_numbers = #tpu.dot_dimension_numbers<[1], [0], [0], [1], [0, 0, 1, 1], [], []>} : vector<8x16xf32>, vector<16x512xf32>, vector<8x512xf32> -> vector<8x512xf32>
    %c0_40 = arith.constant 0 : index
    %c24_41 = arith.constant 24 : index
    %c0_42 = arith.constant 0 : index
    %41 = vector.load %arg4[%c0_40, %c24_41, %c0_42] : memref<1x32x512xf32, #tpu.memory_space<vmem>>, vector<1x8x512xf32>
    %42 = vector.shape_cast %41 : vector<1x8x512xf32> to vector<8x512xf32>
    %43 = vector.shape_cast %40 : vector<8x512xf32> to vector<1x8x512xf32>
    tpu.vector_store %arg4[%c0_40, %c24_41, %c0_42], %43 {strides = array<i32>} : memref<1x32x512xf32, #tpu.memory_space<vmem>>, vector<1x8x512xf32>,
    return
  }
  func.func @transform_0(%arg0: i32, %arg1: i32) -> (i32, i32, i32) {
    %c0_i32 = arith.constant 0 : i32
    %c0_i32_0 = arith.constant 0 : i32
    return %arg0, %c0_i32, %arg1 : i32, i32, i32
  }
  func.func @transform_1(%arg0: i32, %arg1: i32) -> (i32, i32) {
    %c0_i32 = arith.constant 0 : i32
    %c0_i32_0 = arith.constant 0 : i32
    %c0_i32_1 = arith.constant 0 : i32
    return %c0_i32, %c0_i32_0 : i32, i32
  }
  func.func @transform_2(%arg0: i32, %arg1: i32) -> (i32, i32, i32) {
    %c0_i32 = arith.constant 0 : i32
    %c0_i32_0 = arith.constant 0 : i32
    return %arg0, %c0_i32, %arg1 : i32, i32, i32
  }
}

</mosaic_0001>

<bundles_post_ra>
// kernel: tpu_custom_call.1
= control target key start
LH: loop header
LB: loop body
LE: loop exit
PB: predicated region body
PF: predicated region fallthrough
CT: control target
= control target key end

     0   :  { %7 = vsyncpa [#allocation4], 0  ;;  %s1504_s0 = inlined_call_operand.hbm [shape: f32[2,8,512], index: 0, kind: input, shape index: {}]   ;;  %s1505_s1 = inlined_call_operand.hbm [shape: f32[72,128], index: 1, kind: input, shape index: {}]   ;;  %s1506_s2 = inlined_call_operand.hbm [shape: f32[2,32,512], index: 2, kind: output, shape index: {}]  }
   0x1   :  { %9 = vsyncpa [#allocation4 + $0x1], 0 }
   0x2   :  { %10 = vsyncpa [#allocation7], 0 }
   0x3   :  { %11 = vsyncpa [#allocation5], 0 }
   0x4   :  { %13 = vsyncpa [#allocation5 + $0x1], 0  ;;  %s1261_s9 = smov 0   ;;  %s1263_s10 = smov 0  }
   0x5   :  { %s1265_s11 = smov 0   ;;  %s1267_s12 = smov 0  }
   0x6   :  { %s1269_s13 = smov 0   ;;  %s1271_s14 = smov 0  }
   0x7 LB: > { %s961_s15 = sadd.s32 4294967295, %s1239_s14   ;;  %p963_p0 = scmp.ge.s32.totalorder %s1239_s14, 1  ;;  %s1239_s14 = sphi %s1271_s14, %s19_s14   ;;  %s1235_s13 = sphi %s1269_s13, %s1517_s13   ;;  %s1231_s12 = sphi %s1267_s12, %s1516_s12   ;;  %s1227_s11 = sphi %s1265_s11, %s1515_s11   ;;  %s1223_s10 = sphi %s1263_s10, %s1514_s10   ;;  %s1219_s9 = sphi %s1261_s9, %s1513_s9  }
   0x8   : > { %p1293_p1 = scmp.eq.s32.totalorder %s961_s15, 0  ;;  %p113_p2 = scmp.lt.s32.totalorder %s1239_s14, 3 }
   0x9   : > { %s124_s19 = sshll.u32 %s1505_s1, 4  ;;  %s1241_s21 = smov [#allocation6]   ;;  %s125_s19 = int_to_ptr.hbm [resolvable:$true] %s124_s19 }
   0xa   : > { %p1301_p3 = pnand %p963_p0, %p113_p2  ;;  %s126_s22 = sshll.u32 %s1241_s21, 4  ;;  %s127_s22 = int_to_ptr.vmem [resolvable:$true] %s126_s22 }
   0xb   : > { %p965_p6 = scmp.ge.s32.totalorder %s1239_s14, 2  ;;  %s1242_s23 = smov 128  }
   0xc   : > { %p1024_p4 = pneg %p1301_p3  ;;  %s1243_s24 = smov 8  }
   0xd   : > { %s962_s25 = sadd.s32 4294967294, %s1239_s14   ;;  %s31_s26 = sadd.s32 1, %s1235_s13 }
   0xe   : > { %p1025_p5 = pnand %p1024_p4, %p1293_p1  ;;  %s40_s27 = sadd.s32 1, %s1227_s11 }
   0xf   : > { %p33_p7 = scmp.ge.s32.totalorder %s31_s26, 2  ;;  %p47_p8 = scmp.ne.s32.totalorder %s1227_s11, %s1223_s10 }
  0x10   : > { %1027 = dma.hbm_to_vmem [thread:$0]  (!%p1025_p5), %s125_s19, 1152, %s127_s22, [#allocation7], %s1242_s23, %s1242_s23, %s1243_s24  }
  0x11   : > { %p48_p9 = scmp.eq.s32.totalorder %s1239_s14, 0  ;;  %p53_p10 = scmp.ne.s32.totalorder %s1223_s10, %s1219_s9 }
  0x12   : > { %s1519_s26 = smov (%p33_p7, %s31_s26), 0  ;;  %p100_p13 = scmp.eq.s32.totalorder %s961_s15, 1 }
  0x13   : > { %p1320_p11 = por %p48_p9, %p47_p8  ;;  %p1326_p12 = por %p1293_p1, %p53_p10 }
  0x14   : > { %s35_s30 = ssub.s32 %s1235_s13, %s1519_s26  ;;  %p106_p2 = scmp.eq.s32.totalorder %s962_s25, 1 }
  0x15   : > { %p38_p0 = scmp.eq.s32.totalorder %s35_s30, 0  ;;  %p1332_p4 = por %p100_p13, %p47_p8 }
  0x16   : > { %p1037_p5 = scmp.lt.s32.totalorder %s1239_s14, 2  ;;  %p1340_p7 = por %p106_p2, %p53_p10 }
  0x17   : > { %s1338_s4 = scalar_select %p38_p0, %s1227_s11, %s40_s27  }
  0x18   : > { %s140_s6 = sand.u32 1, %s1227_s11   ;;  %s1014_s8 = sshll.u32 %s1235_s13, 5 }
  0x19   : > { %s966_s7 = sshll.u32 %s140_s6, 5  ;;  %s151_s15 = scalar_lea.hbm %s1504_s0, %s1014_s8 }
  0x1a   : > { %s144_s19 = scalar_lea.vmem [#allocation3], %s966_s7  ;;  %s153_s22 = sshll.u32 %s151_s15, 4  ;;  %s154_s22 = int_to_ptr.hbm [resolvable:$true] %s153_s22 }
  0x1b   : > { %s155_s21 = sshll.u32 %s144_s19, 4  ;;  %p1029_p8 = pnand %p1037_p5, %p1320_p11  ;;  %s156_s21 = int_to_ptr.vmem [resolvable:$true] %s155_s21 }
  0x1c   : > { %s141_s23 = scalar_lea.sflag [#allocation4], %s140_s6  ;;  %164 = sbr.rel (%p1301_p3) target bundleno = 890 (0x37a), region = 28 }
  0x1d   : > { %1031 = dma.hbm_to_vmem [thread:$0]  (!%p1029_p8), %s154_s22, 512, %s156_s21, %s141_s23  }
  0x1e   : > { %s1354_s24 = sand.u32 (!%p1301_p3), 1, %s1223_s10  }
  0x1f   : > { %s970_s25 = sshll.u32 (!%p1301_p3), %s1354_s24, 5  ;;  %s167_s27 = scalar_lea.sflag (!%p1301_p3), [#allocation4], %s1354_s24 }
  0x20   : > { %s170_s30 = scalar_lea.vmem (!%p1301_p3), [#allocation3], %s970_s25 }
  0x21   : > { %1206 = dma.done.wait (%p1326_p12), %s167_s27, 512  }
  0x22   : > { %1208 = vsyncadd (%p1326_p12), %s167_s27, 4294966784 }
  0x23   : > { %1210 = dma.done.wait (%p1293_p1), [#allocation7], 1152  }
  0x24   : > { %1212 = vsyncadd (%p1293_p1), [#allocation7], 4294966144  ;;  %s972_s20 = sshll.u32 %s1354_s24, 7  ;;  %v199_v0 = vld [vmem:[%s170_s30] sm:$0xff]  ;;  %v200_v1 = vld [vmem:[%s170_s30 + $0x8] sm:$0xff]  ;;  %vm221_vm0 = vcmask 64512  }
  0x25   : > { %v201_v2 = vld [vmem:[%s170_s30 + $0x10] sm:$0xff]  ;;  %s1367_s28 = scalar_lea.vmem [#allocation8], %s972_s20  ;;  %v1370_v3 = vmax.f32 %v199_v0, 0.0  ;;  %v1372_v4 = vmax.f32 %v200_v1, 0.0  ;;  %v202_v6 = vld [vmem:[%s170_s30 + $0x18] sm:$0xff]  ;;  %v215_v8 = vld [vmem:[#allocation6] sm:$0xff] }
  0x26   : > { %203 = vst [vmem:[%s1367_s28] sm:$0xff] %v199_v0  ;;  %v1374_v5 = vmax.f32 %v201_v2, 0.0  ;;  %v1377_v7 = vmax.f32 %v202_v6, 0.0  ;;  %v216_v9 = vld [vmem:[#allocation6 + $0x8] sm:$0xff]  ;;  %v328_v20 = vld [vmem:[#allocation6 + $0x10] sm:$0xff]  ;;  %vm329_vm1 = vcmask 130048   ;;  %v425_v31 = vld [vmem:[#allocation6 + $0x18] sm:$0xff] }
  0x27   : > { %204 = vst [vmem:[%s1367_s28 + $0x8] sm:$0xff] %v200_v1  ;;  %243 = vmatpush.msra.mxu0 %v1370_v3  ;;  %266 = vmatpush.msra.mxu1 %v1372_v4  ;;  %v426_v32 = vld [vmem:[#allocation6 + $0x20] sm:$0xff]  ;;  %v541_v45 = vld [vmem:[#allocation6 + $0x28] sm:$0xff]  ;;  %v637_v58 = vld [vmem:[#allocation6 + $0x30] sm:$0xff]  ;;  %vm651_vm2 = vcmask 195584   ;;  %s1015_s16 = sshll.u32 %s1231_s12, 7 }
  0x28   : > { %205 = vst [vmem:[%s1367_s28 + $0x10] sm:$0xff] %v201_v2  ;;  %289 = vmatpush.msra.mxu2 %v1374_v5  ;;  %312 = vmatpush.msra.mxu3 %v1377_v7  ;;  %v638_v59 = vld [vmem:[#allocation6 + $0x38] sm:$0xff]  ;;  %s860_s7 = scalar_lea.hbm %s1506_s2, %s1015_s16  ;;  %s861_s8 = sshll.u32 %s1367_s28, 4  ;;  %s862_s8 = int_to_ptr.vmem [resolvable:$true] %s861_s8 }
  0x29   : > { %206 = vst [vmem:[%s1367_s28 + $0x18] sm:$0xff] %v202_v6  ;;  %973 = vmatmul.msk.f32.vlgmr.msra.gmra.mxu0 %vm221_vm0, %v215_v8  ;;  %975 = vmatmul.msk.f32.vlgmr.msra.gmra.mxu1 %vm221_vm0, %v215_v8  ;;  %s863_s17 = sshll.u32 %s860_s7, 4  ;;  %s847_s18 = scalar_lea.sflag [#allocation5], %s1354_s24  ;;  %s864_s17 = int_to_ptr.hbm [resolvable:$true] %s863_s17 }
  0x2a   : > { %977 = vmatmul.msk.f32.vlgmr.msra.gmra.mxu2 %vm221_vm0, %v215_v8  ;;  %979 = vmatmul.msk.f32.vlgmr.msra.gmra.mxu3 %vm221_vm0, %v215_v8  ;;  %s1167_s15 = sshra.s32 %s864_s17, 4  ;;  %s1173_s22 = scalar_lea.hbm %s1506_s2, 256  ;;  %s1168_s15 = int_to_ptr.hbm [resolvable:$true] %s1167_s15 }
  0x2b   : > { %s1169_s19 = scalar_lea.hbm %s1168_s15, 128  ;;  %p1174_p10 = scmp.lt.s32.totalorder %s1168_s15, %s1506_s2 }
  0x2c   : > { %p1170_p1 = scmp.ne.s32.totalorder %s1168_s15, %s1169_s19  ;;  %p1175_p11 = scmp.lt.s32.totalorder %s1173_s22, %s1169_s19 }
  0x2e   : > { %p1171_p3 = pnand %p1170_p1, %p1332_p4  ;;  %p1176_p12 = por %p1175_p11, %p1174_p10 }
  0x30   : > { %p1172_p9 = pneg %p1171_p3 }
  0x31   : > { %974 = vmatmul.msk.f32.gmra.mxu0 %vm221_vm0, %v216_v9  ;;  %976 = vmatmul.msk.f32.gmra.mxu1 %vm221_vm0, %v216_v9 }
  0x32   : > { %978 = vmatmul.msk.f32.gmra.mxu2 %vm221_vm0, %v216_v9  ;;  %980 = vmatmul.msk.f32.gmra.mxu3 %vm221_vm0, %v216_v9  ;;  %p1177_p13 = pnand %p1176_p12, %p1172_p9 }
  0xa6   : > { %v245_v10 = vpop.f32.mrf.mxu0  ;;  %v268_v11 = vpop.f32.mrf.mxu1 }
  0xa7   : > { %v320_v16 = vmax.f32 %v245_v10, 0.0  ;;  %v321_v17 = vmax.f32 %v268_v11, 0.0 }
  0xad   : > { %v291_v12 = vpop.f32.mrf.mxu2  ;;  %v314_v13 = vpop.f32.mrf.mxu3 }
  0xae   : > { %v248_v14 = vpop.f32.mrf.mxu0  ;;  %v271_v15 = vpop.f32.mrf.mxu1  ;;  %v322_v25 = vmax.f32 %v291_v12, 0.0  ;;  %v323_v26 = vmax.f32 %v314_v13, 0.0 }
  0xaf   : > { %v324_v18 = vmax.f32 %v248_v14, 0.0  ;;  %v325_v19 = vmax.f32 %v271_v15, 0.0 }
  0xb1   : > { %347 = vmatpush.msrb.mxu0 %v324_v18  ;;  %367 = vmatpush.msrb.mxu1 %v325_v19 }
  0xb3   : > { %348 = vmatpush.msrb.mxu0 %v320_v16  ;;  %368 = vmatpush.msrb.mxu1 %v321_v17 }
  0xb4   : > { %981 = vmatmul.msk.f32.vlgmr.msrb.gmra.mxu0 %vm329_vm1, %v328_v20  ;;  %982 = vmatmul.msk.f32.vlgmr.msrb.gmra.mxu1 %vm329_vm1, %v328_v20 }
  0xb5   : > { %v294_v21 = vpop.f32.mrf.mxu2  ;;  %v317_v22 = vpop.f32.mrf.mxu3 }
  0xb6   : > { %v326_v23 = vmax.f32 %v294_v21, 0.0  ;;  %v327_v24 = vmax.f32 %v317_v22, 0.0 }
  0xb8   : > { %387 = vmatpush.msrb.mxu2 %v326_v23  ;;  %407 = vmatpush.msrb.mxu3 %v327_v24 }
  0xba   : > { %388 = vmatpush.msrb.mxu2 %v322_v25  ;;  %408 = vmatpush.msrb.mxu3 %v323_v26 }
  0xbb   : > { %983 = vmatmul.msk.f32.vlgmr.msrb.gmra.mxu2 %vm329_vm1, %v328_v20  ;;  %984 = vmatmul.msk.f32.vlgmr.msrb.gmra.mxu3 %vm329_vm1, %v328_v20 }
 0x131   : > { %v1389_v27 = vpop.f32.mrf.mxu0  ;;  %v1391_v28 = vpop.f32.mrf.mxu1 }
 0x132   : > { %413 = vst [vmem:[%s1367_s28 + $0x20] sm:$0xff] %v1389_v27  ;;  %v417_v29 = vmax.f32 %v1389_v27, 0.0  ;;  %v418_v30 = vmax.f32 %v1391_v28, 0.0 }
 0x133   : > { %414 = vst [vmem:[%s1367_s28 + $0x28] sm:$0xff] %v1391_v28 }
 0x134   : > { %455 = vmatpush.msra.mxu0 %v417_v29  ;;  %478 = vmatpush.msra.mxu1 %v418_v30 }
 0x136   : > { %456 = vmatpush.msra.mxu0 %v1370_v3  ;;  %479 = vmatpush.msra.mxu1 %v1372_v4 }
 0x137   : > { %985 = vmatmul.msk.f32.vlgmr.msra.gmra.mxu0 %vm329_vm1, %v425_v31  ;;  %987 = vmatmul.msk.f32.vlgmr.msra.gmra.mxu1 %vm329_vm1, %v425_v31 }
 0x13e   : > { %v1407_v33 = vpop.f32.mrf.mxu2  ;;  %v1409_v34 = vpop.f32.mrf.mxu3 }
 0x13f   : > { %415 = vst [vmem:[%s1367_s28 + $0x30] sm:$0xff] %v1407_v33  ;;  %v419_v35 = vmax.f32 %v1407_v33, 0.0  ;;  %v420_v36 = vmax.f32 %v1409_v34, 0.0  ;;  %986 = vmatmul.msk.f32.gmra.mxu0 %vm329_vm1, %v426_v32  ;;  %988 = vmatmul.msk.f32.gmra.mxu1 %vm329_vm1, %v426_v32 }
 0x140   : > { %416 = vst [vmem:[%s1367_s28 + $0x38] sm:$0xff] %v1409_v34 }
 0x141   : > { %501 = vmatpush.msra.mxu2 %v419_v35  ;;  %524 = vmatpush.msra.mxu3 %v420_v36 }
 0x143   : > { %502 = vmatpush.msra.mxu2 %v1374_v5  ;;  %525 = vmatpush.msra.mxu3 %v1377_v7 }
 0x144   : > { %989 = vmatmul.msk.f32.vlgmr.msra.gmra.mxu2 %vm329_vm1, %v425_v31  ;;  %991 = vmatmul.msk.f32.vlgmr.msra.gmra.mxu3 %vm329_vm1, %v425_v31 }
 0x14c   : > { %990 = vmatmul.msk.f32.gmra.mxu2 %vm329_vm1, %v426_v32  ;;  %992 = vmatmul.msk.f32.gmra.mxu3 %vm329_vm1, %v426_v32 }
 0x1b4   : > { %v458_v37 = vpop.f32.mrf.mxu0  ;;  %v481_v38 = vpop.f32.mrf.mxu1 }
 0x1b5   : > { %v533_v41 = vmax.f32 %v458_v37, 0.0  ;;  %v534_v42 = vmax.f32 %v481_v38, 0.0 }
 0x1bc   : > { %v461_v39 = vpop.f32.mrf.mxu0  ;;  %v484_v40 = vpop.f32.mrf.mxu1 }
 0x1bd   : > { %v537_v43 = vmax.f32 %v461_v39, 0.0  ;;  %v538_v44 = vmax.f32 %v484_v40, 0.0 }
 0x1bf   : > { %559 = vmatpush.msrb.mxu0 %v537_v43  ;;  %579 = vmatpush.msrb.mxu1 %v538_v44 }
 0x1c1   : > { %560 = vmatpush.msrb.mxu0 %v533_v41  ;;  %580 = vmatpush.msrb.mxu1 %v534_v42 }
 0x1c2   : > { %993 = vmatmul.msk.f32.vlgmr.msrb.gmra.mxu0 %vm329_vm1, %v541_v45  ;;  %994 = vmatmul.msk.f32.vlgmr.msrb.gmra.mxu1 %vm329_vm1, %v541_v45 }
 0x1c7   : > { %v504_v46 = vpop.f32.mrf.mxu2  ;;  %v527_v47 = vpop.f32.mrf.mxu3 }
 0x1c8   : > { %v535_v52 = vmax.f32 %v504_v46, 0.0  ;;  %v536_v53 = vmax.f32 %v527_v47, 0.0 }
 0x1cf   : > { %v507_v48 = vpop.f32.mrf.mxu2  ;;  %v530_v49 = vpop.f32.mrf.mxu3 }
 0x1d0   : > { %v539_v50 = vmax.f32 %v507_v48, 0.0  ;;  %v540_v51 = vmax.f32 %v530_v49, 0.0 }
 0x1d2   : > { %599 = vmatpush.msrb.mxu2 %v539_v50  ;;  %619 = vmatpush.msrb.mxu3 %v540_v51 }
 0x1d4   : > { %600 = vmatpush.msrb.mxu2 %v535_v52  ;;  %620 = vmatpush.msrb.mxu3 %v536_v53 }
 0x1d5   : > { %995 = vmatmul.msk.f32.vlgmr.msrb.gmra.mxu2 %vm329_vm1, %v541_v45  ;;  %996 = vmatmul.msk.f32.vlgmr.msrb.gmra.mxu3 %vm329_vm1, %v541_v45 }
 0x23f   : > { %v562_v54 = vpop.f32.mrf.mxu0  ;;  %v582_v55 = vpop.f32.mrf.mxu1 }
 0x240   : > { %625 = vst [vmem:[%s1367_s28 + $0x40] sm:$0xff] %v562_v54  ;;  %v629_v56 = vmax.f32 %v562_v54, 0.0  ;;  %v630_v57 = vmax.f32 %v582_v55, 0.0 }
 0x241   : > { %626 = vst [vmem:[%s1367_s28 + $0x48] sm:$0xff] %v582_v55 }
 0x242   : > { %671 = vmatpush.msra.mxu0 %v629_v56  ;;  %694 = vmatpush.msra.mxu1 %v630_v57 }
 0x244   : > { %672 = vmatpush.msra.mxu0 %v417_v29  ;;  %695 = vmatpush.msra.mxu1 %v418_v30 }
 0x246   : > { %673 = vmatpush.msra.mxu0 %v1370_v3  ;;  %696 = vmatpush.msra.mxu1 %v1372_v4 }
 0x247   : > { %997 = vmatmul.msk.f32.vlgmr.msra.gmra.mxu0 %vm651_vm2, %v637_v58  ;;  %999 = vmatmul.msk.f32.vlgmr.msra.gmra.mxu1 %vm651_vm2, %v637_v58 }
 0x24f   : > { %998 = vmatmul.msk.f32.gmra.mxu0 %vm651_vm2, %v638_v59  ;;  %1000 = vmatmul.msk.f32.gmra.mxu1 %vm651_vm2, %v638_v59 }
 0x258   : > { %v602_v60 = vpop.f32.mrf.mxu2  ;;  %v622_v61 = vpop.f32.mrf.mxu3 }
 0x259   : > { %627 = vst [vmem:[%s1367_s28 + $0x50] sm:$0xff] %v602_v60  ;;  %v631_v62 = vmax.f32 %v602_v60, 0.0  ;;  %v632_v63 = vmax.f32 %v622_v61, 0.0 }
 0x25a   : > { %628 = vst [vmem:[%s1367_s28 + $0x58] sm:$0xff] %v622_v61 }
 0x25b   : > { %717 = vmatpush.msra.mxu2 %v631_v62  ;;  %740 = vmatpush.msra.mxu3 %v632_v63 }
 0x25d   : > { %718 = vmatpush.msra.mxu2 %v419_v35  ;;  %741 = vmatpush.msra.mxu3 %v420_v36 }
 0x25f   : > { %719 = vmatpush.msra.mxu2 %v1374_v5  ;;  %742 = vmatpush.msra.mxu3 %v1377_v7  ;;  %v758_v5 = vld [vmem:[#allocation6 + $0x40] sm:$0xff] }
 0x260   : > { %1001 = vmatmul.msk.f32.vlgmr.msra.gmra.mxu2 %vm651_vm2, %v637_v58  ;;  %1003 = vmatmul.msk.f32.vlgmr.msra.gmra.mxu3 %vm651_vm2, %v637_v58 }
 0x268   : > { %1002 = vmatmul.msk.f32.gmra.mxu2 %vm651_vm2, %v638_v59  ;;  %1004 = vmatmul.msk.f32.gmra.mxu3 %vm651_vm2, %v638_v59 }
 0x2c4   : > { %v675_v0 = vpop.f32.mrf.mxu0  ;;  %v698_v1 = vpop.f32.mrf.mxu1 }
 0x2c5   : > { %v750_v4 = vmax.f32 %v675_v0, 0.0  ;;  %v751_v6 = vmax.f32 %v698_v1, 0.0 }
 0x2cc   : > { %v678_v2 = vpop.f32.mrf.mxu0  ;;  %v701_v3 = vpop.f32.mrf.mxu1 }
 0x2cd   : > { %v754_v8 = vmax.f32 %v678_v2, 0.0  ;;  %v755_v9 = vmax.f32 %v701_v3, 0.0 }
 0x2cf   : > { %776 = vmatpush.msrb.mxu0 %v754_v8  ;;  %796 = vmatpush.msrb.mxu1 %v755_v9 }
 0x2d1   : > { %777 = vmatpush.msrb.mxu0 %v750_v4  ;;  %797 = vmatpush.msrb.mxu1 %v751_v6 }
 0x2d2   : > { %1005 = vmatmul.msk.f32.vlgmr.msrb.gmra.mxu0 %vm329_vm1, %v758_v5  ;;  %1006 = vmatmul.msk.f32.vlgmr.msrb.gmra.mxu1 %vm329_vm1, %v758_v5 }
 0x2e3   : > { %v721_v7 = vpop.f32.mrf.mxu2  ;;  %v744_v10 = vpop.f32.mrf.mxu3 }
 0x2e4   : > { %v752_v15 = vmax.f32 %v721_v7, 0.0  ;;  %v753_v16 = vmax.f32 %v744_v10, 0.0 }
 0x2eb   : > { %v724_v11 = vpop.f32.mrf.mxu2  ;;  %v747_v12 = vpop.f32.mrf.mxu3 }
 0x2ec   : > { %v756_v13 = vmax.f32 %v724_v11, 0.0  ;;  %v757_v14 = vmax.f32 %v747_v12, 0.0 }
 0x2ee   : > { %816 = vmatpush.msrb.mxu2 %v756_v13  ;;  %836 = vmatpush.msrb.mxu3 %v757_v14 }
 0x2f0   : > { %817 = vmatpush.msrb.mxu2 %v752_v15  ;;  %837 = vmatpush.msrb.mxu3 %v753_v16 }
 0x2f1   : > { %1007 = vmatmul.msk.f32.vlgmr.msrb.gmra.mxu2 %vm329_vm1, %v758_v5  ;;  %1008 = vmatmul.msk.f32.vlgmr.msrb.gmra.mxu3 %vm329_vm1, %v758_v5 }
 0x34f   : > { %v779_v17 = vpop.f32.mrf.mxu0  ;;  %v799_v18 = vpop.f32.mrf.mxu1 }
 0x350   : > { %842 = vst [vmem:[%s1367_s28 + $0x60] sm:$0xff] %v779_v17 }
 0x351   : > { %843 = vst [vmem:[%s1367_s28 + $0x68] sm:$0xff] %v799_v18 }
 0x374   : > { %v819_v19 = vpop.f32.mrf.mxu2  ;;  %v839_v20 = vpop.f32.mrf.mxu3 }
 0x375   : > { %844 = vst [vmem:[%s1367_s28 + $0x70] sm:$0xff] %v819_v19 }
 0x376   : > { %845 = vst [vmem:[%s1367_s28 + $0x78] sm:$0xff] %v839_v20 }
 0x377   : > { %1180 = shalt.err (!%p1177_p13)
}
 0x378   : > { %s1244_s24 = smov 512   ;;  %s1245_s27 = smov 32  }
 0x379   : > { %1022 = dma.vmem_to_hbm [thread:$0]  (%p1332_p4), %s862_s8, 2048, %s864_s17, %s847_s18, %s1244_s24, %s1244_s24, %s1245_s27  }
 0x37a PF: > { %s878_s30 = sand.u32 1, %s1219_s9   ;;  %p1033_p0 = pnand %p965_p6, %p1340_p7 }
 0x37b   : > { %s879_s20 = scalar_lea.sflag [#allocation5], %s878_s30 }
 0x37c   : > { %p1034_p2 = pneg %p1033_p0 }
 0x37e   : > { %1214 = dma.done.wait (%p1034_p2), %s879_s20, 2048  }
 0x37f   : > { %1216 = vsyncadd (%p1034_p2), %s879_s20, 4294965248  ;;  %s19_s14 = sadd.s32 1, %s1239_s14   ;;  %s1513_s9 = smov %s1223_s10 }
 0x380   : > { %p16_p5 = scmp.ge.s32.totalorder %s19_s14, 4   ;;  %s1514_s10 = smov %s1227_s11 }
 0x381   : > { %s1515_s11 = smov %s1338_s4  ;;  %s1516_s12 = smov %s1235_s13 }
 0x382   : > { %s1517_s13 = smov %s1519_s26  ;;  %18 = sbr.rel (!%p16_p5) target bundleno = 7 (0x7), region = 77 }
 0x387   :  { %885 = vsyncpa [#allocation4], 1 }
 0x388   :  { %887 = vsyncpa [#allocation4 + $0x1], 1 }
 0x389   :  { %888 = vsyncpa [#allocation7], 1 }
 0x38a   :  { %889 = vsyncpa [#allocation5], 1 }
 0x38b   :  { %891 = vsyncpa [#allocation5 + $0x1], 1 }

</bundles_post_ra>
